<compile_context>
chip_gen: v5e
topology: v5e:2x2
jax: 0.10.0
libtpu: 0.0.40
codegen_flags: <defaults>
</compile_context>

<pallas_src>
import jax
import jax.numpy as jnp
from jax.experimental import pallas as pl
from jax.experimental.pallas import tpu as pltpu


def _mlp_kernel(sb_ref,                         # SMEM (2,): [star_scale, star_bias]
                x_ref,                          # (1, C, tile_l)
                w1t_ref, b1_ref,                # (hidden, C), (hidden, 1)
                w2t_ref, b2_ref,                # (out, hidden), (out, 1)
                o_ref):                         # (1, out, tile_l)
    s = sb_ref[0]
    b = sb_ref[1]

    # fc1: (hidden, C) @ (C, tile_l) -> (hidden, tile_l), f32 accumulation.
    # Cast to the weight dtype (f32 by default, bf16 if enabled in the wrapper)
    # for the MXU operands only; all elementwise math stays f32 (v5e-friendly).
    x = x_ref[0].astype(w1t_ref.dtype)
    h = jnp.dot(w1t_ref[...], x, preferred_element_type=jnp.float32)
    h = h + b1_ref[...]                         # broadcast (hidden, 1) over lanes

    # StarReLU: s * relu(h)^2 + b   (f32)
    r = jnp.maximum(h, 0.0)
    a = s * (r * r) + b

    # fc2: (out, hidden) @ (hidden, tile_l) -> (out, tile_l)
    y = jnp.dot(w2t_ref[...], a.astype(w2t_ref.dtype),
                preferred_element_type=jnp.float32)
    y = y + b2_ref[...]                         # broadcast (out, 1) over lanes

    o_ref[0] = y.astype(o_ref.dtype)


def _choose_tile_l(L, max_tile):
    """Largest lane-aligned (multiple of 128) tile that divides L, capped at
    max_tile. Falls back to the full row (always a legal full-dim block)."""
    if L <= max_tile:
        return L
    t = (max_tile // 128) * 128
    while t >= 128:
        if L % t == 0:
            return t
        t -= 128
    return L


def mlp_pallas(x_nchw, w1, b1, w2, b2, star_scale, star_bias, *,
               max_tile_l=1024, matmul_dtype=jnp.float32):
    """x_nchw: (B, C, H, W) float32.
    w1: (C, hidden), b1: (hidden,), w2: (hidden, out), b2: (out,).
    matmul_dtype: set to jnp.bfloat16 on v6e/v7x to halve weight bytes and use
    the bf16 MXU path (accumulation stays f32)."""
    B, C, H, W = x_nchw.shape
    hidden = w1.shape[1]
    out_dim = w2.shape[1]
    L = H * W

    tile_l = _choose_tile_l(L, max_tile_l)
    grid = (B, L // tile_l)

    # Free reshape; channels on sublanes, pixels on lanes.
    x_bcl = x_nchw.reshape(B, C, L)

    # Transposed weights so the kernel contracts on the sublane axis. (A real
    # Conv2d weight is already (out, in, 1, 1), i.e. already in this layout.)
    w1t = jnp.transpose(w1).astype(matmul_dtype)            # (hidden, C)
    w2t = jnp.transpose(w2).astype(matmul_dtype)            # (out, hidden)
    b1c = b1.reshape(hidden, 1).astype(jnp.float32)
    b2c = b2.reshape(out_dim, 1).astype(jnp.float32)

    # StarReLU scalars in one tiny 1-D SMEM array (no (8,128)-padded 2-D blocks).
    sb = jnp.stack([jnp.asarray(star_scale, jnp.float32).reshape(()),
                    jnp.asarray(star_bias, jnp.float32).reshape(())])

    out_bcl = pl.pallas_call(
        _mlp_kernel,
        out_shape=jax.ShapeDtypeStruct((B, out_dim, L), x_nchw.dtype),
        grid_spec=pltpu.PrefetchScalarGridSpec(
            num_scalar_prefetch=0,
            grid=grid,
            in_specs=[
                pl.BlockSpec(memory_space=pltpu.SMEM),               # [s, b]
                pl.BlockSpec((1, C, tile_l), lambda bi, li: (bi, 0, li)),   # x
                pl.BlockSpec((hidden, C), lambda bi, li: (0, 0)),    # W1^T
                pl.BlockSpec((hidden, 1), lambda bi, li: (0, 0)),    # b1
                pl.BlockSpec((out_dim, hidden), lambda bi, li: (0, 0)),  # W2^T
                pl.BlockSpec((out_dim, 1), lambda bi, li: (0, 0)),   # b2
            ],
            out_specs=pl.BlockSpec((1, out_dim, tile_l),
                                   lambda bi, li: (bi, 0, li)),
        ),
        compiler_params=pltpu.CompilerParams(
            dimension_semantics=("parallel", "parallel"),
            vmem_limit_bytes=48 * 1024 * 1024,
        ),
    )(sb, x_bcl, w1t, b1c, w2t, b2c)

    # (B, out, L) -> (B, out, H, W): free reshape, already NCHW.
    return out_bcl.reshape(B, out_dim, H, W)


def mlp_reference(x_nchw, w1, b1, w2, b2, star_scale, star_bias):
    """Pure-JAX reference matching the PyTorch forward."""
    x = jnp.transpose(x_nchw, (0, 2, 3, 1))                 # NHWC
    h = jnp.einsum("bhwc,cd->bhwd", x, w1) + b1
    a = star_scale * jnp.maximum(h, 0.0) ** 2 + star_bias
    y = jnp.einsum("bhwd,do->bhwo", a, w2) + b2
    return jnp.transpose(y, (0, 3, 1, 2))                   # NCHW


if __name__ == "__main__":
    key = jax.random.PRNGKey(0)
    B, C, Hs, Ws = 2, 4, 16, 16
    hidden_dim = 32
    out_dim = C  # out_dim = out_dim or dim

    k_x, k_w1, k_b1, k_w2, k_b2 = jax.random.split(key, 5)
    x = jax.random.normal(k_x, (B, C, Hs, Ws), dtype=jnp.float32)

    # Conv2d 1x1 weights (out, in, 1, 1) represented as (in, out) matrices.
    w1 = jax.random.normal(k_w1, (C, hidden_dim), dtype=jnp.float32) * 0.1
    b1 = jax.random.normal(k_b1, (hidden_dim,), dtype=jnp.float32) * 0.1
    w2 = jax.random.normal(k_w2, (hidden_dim, out_dim), dtype=jnp.float32) * 0.1
    b2 = jax.random.normal(k_b2, (out_dim,), dtype=jnp.float32) * 0.1
    star_scale = jnp.float32(1.0)   # StarReLU scale_value
    star_bias = jnp.float32(0.0)    # StarReLU bias_value

    out = mlp_pallas(x, w1, b1, w2, b2, star_scale, star_bias)
    out = jax.block_until_ready(out)

    ref = mlp_reference(x, w1, b1, w2, b2, star_scale, star_bias)
    assert out.shape == (B, out_dim, Hs, Ws), out.shape
    assert jnp.allclose(out, ref, atol=1e-5, rtol=1e-5), "mismatch vs reference"

    print("KERNEL_OK")
</pallas_src>

<mosaic_0001>
module attributes {stable_mosaic.version = 11 : i64} {
  func.func @_mlp_kernel(%arg0: i32, %arg1: i32, %arg2: memref<2xf32, #tpu.memory_space<smem>>, %arg3: memref<1x4x256xf32, #tpu.memory_space<vmem>>, %arg4: memref<32x4xf32, #tpu.memory_space<vmem>>, %arg5: memref<32x1xf32, #tpu.memory_space<vmem>>, %arg6: memref<4x32xf32, #tpu.memory_space<vmem>>, %arg7: memref<4x1xf32, #tpu.memory_space<vmem>>, %arg8: memref<1x4x256xf32, #tpu.memory_space<vmem>>) attributes {dimension_semantics = [#tpu.dimension_semantics<parallel>, #tpu.dimension_semantics<parallel>], iteration_bounds = array<i64: 2, 1>, scalar_prefetch = 0 : i64, scratch_operands = 0 : i64, tpu.core_type = #tpu.core_type<tc>, window_params = [{transform_indices = @transform_0, window_bounds = array<i64: 2>}, {transform_indices = @transform_1, window_bounds = array<i64: 1, 4, 256>}, {pipeline_mode = #tpu.pipeline_mode<synchronous>, transform_indices = @transform_2, window_bounds = array<i64: 32, 4>}, {pipeline_mode = #tpu.pipeline_mode<synchronous>, transform_indices = @transform_3, window_bounds = array<i64: 32, 1>}, {pipeline_mode = #tpu.pipeline_mode<synchronous>, transform_indices = @transform_4, window_bounds = array<i64: 4, 32>}, {pipeline_mode = #tpu.pipeline_mode<synchronous>, transform_indices = @transform_5, window_bounds = array<i64: 4, 1>}, {transform_indices = @transform_6, window_bounds = array<i64: 1, 4, 256>}]} {
    %c0 = arith.constant 0 : index
    %0 = memref.load %arg2[%c0] : memref<2xf32, #tpu.memory_space<smem>>
    %c1 = arith.constant 1 : index
    %1 = memref.load %arg2[%c1] : memref<2xf32, #tpu.memory_space<smem>>
    %c0_0 = arith.constant 0 : index
    %c0_1 = arith.constant 0 : index
    %c0_2 = arith.constant 0 : index
    %2 = vector.load %arg3[%c0_0, %c0_1, %c0_2] : memref<1x4x256xf32, #tpu.memory_space<vmem>>, vector<1x4x256xf32>
    %3 = vector.shape_cast %2 : vector<1x4x256xf32> to vector<4x256xf32>
    %c0_3 = arith.constant 0 : index
    %c0_4 = arith.constant 0 : index
    %4 = vector.load %arg4[%c0_3, %c0_4] : memref<32x4xf32, #tpu.memory_space<vmem>>, vector<32x4xf32>
    %cst = arith.constant dense<0.000000e+00> : vector<32x256xf32>
    %5 = tpu.matmul %4, %3, %cst {dimension_numbers = #tpu.dot_dimension_numbers<[1], [0], [0], [1], [0, 0, 1, 1], [], []>} : vector<32x4xf32>, vector<4x256xf32>, vector<32x256xf32> -> vector<32x256xf32>
    %c0_5 = arith.constant 0 : index
    %c0_6 = arith.constant 0 : index
    %6 = vector.load %arg5[%c0_5, %c0_6] : memref<32x1xf32, #tpu.memory_space<vmem>>, vector<32x1xf32>
    %7 = vector.broadcast %6 : vector<32x1xf32> to vector<32x256xf32>
    %8 = arith.addf %5, %7 : vector<32x256xf32>
    %cst_7 = arith.constant 0.000000e+00 : f32
    %9 = vector.broadcast %cst_7 : f32 to vector<32x256xf32>
    %10 = arith.maximumf %8, %9 : vector<32x256xf32>
    %11 = arith.mulf %10, %10 : vector<32x256xf32>
    %12 = vector.broadcast %0 : f32 to vector<32x256xf32>
    %13 = arith.mulf %12, %11 : vector<32x256xf32>
    %14 = vector.broadcast %1 : f32 to vector<32x256xf32>
    %15 = arith.addf %13, %14 : vector<32x256xf32>
    %c0_8 = arith.constant 0 : index
    %c0_9 = arith.constant 0 : index
    %16 = vector.load %arg6[%c0_8, %c0_9] : memref<4x32xf32, #tpu.memory_space<vmem>>, vector<4x32xf32>
    %cst_10 = arith.constant dense<0.000000e+00> : vector<4x256xf32>
    %17 = tpu.matmul %16, %15, %cst_10 {dimension_numbers = #tpu.dot_dimension_numbers<[1], [0], [0], [1], [0, 0, 1, 1], [], []>} : vector<4x32xf32>, vector<32x256xf32>, vector<4x256xf32> -> vector<4x256xf32>
    %c0_11 = arith.constant 0 : index
    %c0_12 = arith.constant 0 : index
    %18 = vector.load %arg7[%c0_11, %c0_12] : memref<4x1xf32, #tpu.memory_space<vmem>>, vector<4x1xf32>
    %19 = vector.broadcast %18 : vector<4x1xf32> to vector<4x256xf32>
    %20 = arith.addf %17, %19 : vector<4x256xf32>
    %c0_13 = arith.constant 0 : index
    %c0_14 = arith.constant 0 : index
    %c0_15 = arith.constant 0 : index
    %21 = vector.load %arg8[%c0_13, %c0_14, %c0_15] : memref<1x4x256xf32, #tpu.memory_space<vmem>>, vector<1x4x256xf32>
    %22 = vector.shape_cast %21 : vector<1x4x256xf32> to vector<4x256xf32>
    %23 = vector.shape_cast %20 : vector<4x256xf32> to vector<1x4x256xf32>
    tpu.vector_store %arg8[%c0_13, %c0_14, %c0_15], %23 {strides = array<i32>} : memref<1x4x256xf32, #tpu.memory_space<vmem>>, vector<1x4x256xf32>,
    return
  }
  func.func @transform_0(%arg0: i32, %arg1: i32) -> i32 {
    %c0_i32 = arith.constant 0 : i32
    %c0_i32_0 = arith.constant 0 : i32
    return %c0_i32 : i32
  }
  func.func @transform_1(%arg0: i32, %arg1: i32) -> (i32, i32, i32) {
    %c0_i32 = arith.constant 0 : i32
    %c0_i32_0 = arith.constant 0 : i32
    return %arg0, %c0_i32, %arg1 : i32, i32, i32
  }
  func.func @transform_2(%arg0: i32, %arg1: i32) -> (i32, i32) {
    %c0_i32 = arith.constant 0 : i32
    %c0_i32_0 = arith.constant 0 : i32
    %c0_i32_1 = arith.constant 0 : i32
    return %c0_i32, %c0_i32_0 : i32, i32
  }
  func.func @transform_3(%arg0: i32, %arg1: i32) -> (i32, i32) {
    %c0_i32 = arith.constant 0 : i32
    %c0_i32_0 = arith.constant 0 : i32
    %c0_i32_1 = arith.constant 0 : i32
    return %c0_i32, %c0_i32_0 : i32, i32
  }
  func.func @transform_4(%arg0: i32, %arg1: i32) -> (i32, i32) {
    %c0_i32 = arith.constant 0 : i32
    %c0_i32_0 = arith.constant 0 : i32
    %c0_i32_1 = arith.constant 0 : i32
    return %c0_i32, %c0_i32_0 : i32, i32
  }
  func.func @transform_5(%arg0: i32, %arg1: i32) -> (i32, i32) {
    %c0_i32 = arith.constant 0 : i32
    %c0_i32_0 = arith.constant 0 : i32
    %c0_i32_1 = arith.constant 0 : i32
    return %c0_i32, %c0_i32_0 : i32, i32
  }
  func.func @transform_6(%arg0: i32, %arg1: i32) -> (i32, i32, i32) {
    %c0_i32 = arith.constant 0 : i32
    %c0_i32_0 = arith.constant 0 : i32
    return %arg0, %c0_i32, %arg1 : i32, i32, i32
  }
}

</mosaic_0001>

<bundles_post_ra>
// kernel: tpu_custom_call.1
= control target key start
LH: loop header
LB: loop body
LE: loop exit
PB: predicated region body
PF: predicated region fallthrough
CT: control target
= control target key end

     0   :  { %11 = vsyncpa [#allocation4], 0  ;;  %s985_s0 = inlined_call_operand.vmem [shape: f32[2], index: 0, kind: input, shape index: {}]   ;;  %s986_s1 = inlined_call_operand.vmem [shape: f32[2,4,256], index: 1, kind: input, shape index: {}]   ;;  %s987_s2 = inlined_call_operand.vmem [shape: f32[32,4], index: 2, kind: input, shape index: {}]   ;;  %s988_s3 = inlined_call_operand.vmem [shape: f32[32,1], index: 3, kind: input, shape index: {}]   ;;  %s989_s4 = inlined_call_operand.vmem [shape: f32[4,32], index: 4, kind: input, shape index: {}]   ;;  %s990_s5 = inlined_call_operand.vmem [shape: f32[4,1], index: 5, kind: input, shape index: {}]   ;;  %s991_s6 = inlined_call_operand.hbm [shape: f32[2,4,256], index: 6, kind: output, shape index: {}]  }
   0x1   :  { %12 = vsyncpa [#allocation3], 0 }
   0x2   :  { %14 = vsyncpa [#allocation3 + $0x1], 0  ;;  %s842_s21 = smov 0   ;;  %s844_s22 = smov 0  }
   0x3   :  { %s846_s23 = smov 0   ;;  %s848_s24 = smov 0  }
   0x4   :  { %s850_s25 = smov 0   ;;  %s852_s26 = smov 0  }
   0x5 LB: > { %s604_s27 = sadd.s32 4294967295, %s803_s26   ;;  %s605_s28 = sadd.s32 4294967294, %s803_s26   ;;  %s803_s26 = sphi %s852_s26, %s20_s26   ;;  %s799_s25 = sphi %s850_s25, %s998_s25   ;;  %s795_s24 = sphi %s848_s24, %s997_s24   ;;  %s791_s23 = sphi %s846_s23, %s996_s23   ;;  %s787_s22 = sphi %s844_s22, %s995_s22   ;;  %s783_s21 = sphi %s842_s21, %s994_s21  }
   0x6   : > { %s32_s29 = sadd.s32 1, %s799_s25  ;;  %s174_s30 = sadd.s32 1, %s791_s23 }
   0x7   : > { %p34_p0 = scmp.ge.s32.totalorder %s32_s29, 2  ;;  %p184_p1 = scmp.ne.s32.totalorder %s791_s23, %s787_s22 }
   0x8   : > { %p185_p2 = scmp.eq.s32.totalorder %s604_s27, 1  ;;  %p190_p3 = scmp.ne.s32.totalorder %s787_s22, %s783_s21 }
   0x9   : > { %s1000_s29 = smov (%p34_p0, %s32_s29), 0  ;;  %p191_p5 = scmp.eq.s32.totalorder %s605_s28, 1 }
   0xa   : > { %p882_p4 = por %p185_p2, %p184_p1  ;;  %s169_s8 = ssub.s32 %s799_s25, %s1000_s29 }
   0xb   : > { %p606_p6 = scmp.ge.s32.totalorder %s803_s26, 1  ;;  %p172_p7 = scmp.eq.s32.totalorder %s169_s8, 0 }
   0xc   : > { %p889_p8 = por %p191_p5, %p190_p3  ;;  %p198_p9 = scmp.lt.s32.totalorder %s803_s26, 3 }
   0xd   : > { %s895_s10 = scalar_select %p172_p7, %s791_s23, %s174_s30  }
   0xe   : > { %p199_p10 = pnand %p606_p6, %p198_p9  ;;  %p650_p11 = scmp.eq.s32.totalorder %s604_s27, 0 }
   0xf   : > { %s210_s13 = sshll.u32 %s985_s0, 4  ;;  %s805_s14 = smov [#allocation2]   ;;  %s211_s13 = int_to_ptr.vmem [resolvable:$true] %s210_s13 }
  0x10   : > { %p642_p12 = pneg %p199_p10  ;;  %248 = sbr.rel (%p199_p10) target bundleno = 338 (0x152), region = 44 }
  0x12   : > { %p643_p13 = pnand %p650_p11, %p642_p12 }
  0x14   : > { %645 = dma.vmem_to_smem (!%p643_p13), %s211_s13, 16, %s805_s14, [#allocation4]  }
  0x15   : > { %774 = dma.done.wait (%p650_p11), [#allocation4], 16  }
  0x16   : > { %776 = vsyncadd (%p650_p11), [#allocation4], 4294967280 }
  0x17   : > { %255 = sfence }
  0x18   : > { %p285_p0 = scmp.lt.s32.totalorder %s795_s24, 1  ;;  %v806_v0 = vmov 0   ;;  %v303_v1 = vld [vmem:[%s988_s3 + $0x8] sm:$0xff]  ;;  %v305_v2 = vld [vmem:[%s988_s3 + $0x18] sm:$0xff]  ;;  %v302_v4 = vld [vmem:[%s988_s3] sm:$0xff]  ;;  %vm343_vm0 = vcmask 1043456  }
  0x19   : > { %704 = vset.pattern.permute.xlu1 %v806_v0  ;;  %703 = vset.pattern.permute.xlu0 %v806_v0  ;;  %v304_v5 = vld [vmem:[%s988_s3 + $0x10] sm:$0xff]  ;;  %v298_v6 = vld [vmem:[%s987_s2] sm:$0xff]  ;;  %vm330_vm1 = vcmask 31744   ;;  %v301_v9 = vld [vmem:[%s987_s2 + $0x18] sm:$0xff]  ;;  %s295_s8 = sld [smem:[#allocation2]]  ;;  %vm447_vm2 = vcmask 261120  }
  0x1a   : > { %s286_s19 = scalar_select %p285_p0, %s795_s24, 1  ;;  %313 = vperm.xlu1 %704, %v303_v1   ;;  %323 = vperm.xlu0 %703, %v305_v2   ;;  %v299_v10 = vld [vmem:[%s987_s2 + $0x8] sm:$0xff]  ;;  %v300_v11 = vld [vmem:[%s987_s2 + $0x10] sm:$0xff]  ;;  %v441_v15 = vld [vmem:[%s990_s5] sm:$0xf] }
  0x1b   : > { %705 = vset.pattern.permute.xlu2 %v806_v0  ;;  %s614_s11 = sld [smem:[#allocation2 + $0x1]]  ;;  %v440_v2 = vld [vmem:[%s989_s4] sm:$0xf]  ;;  %s281_s14 = sand.u32 1, %s787_s22  }
  0x1c   : > { %s632_s20 = sshll.u32 %s286_s19, 3  ;;  %444 = vperm.xlu2 %705, %v441_v15   ;;  %s611_s15 = sshll.u32 %s281_s14, 3 }
  0x1d   : > { %s292_s30 = scalar_lea.vmem %s986_s1, %s632_s20  ;;  %s633_s16 = sshll.u32 %s795_s24, 3 }
  0x1e   : > { %v297_v3 = vld [vmem:[%s292_s30] sm:$0xff]  ;;  %s511_s19 = scalar_lea.hbm %s991_s6, %s633_s16  ;;  %s283_s20 = scalar_lea.vmem [#allocation5], %s611_s15 }
  0x1f   : > { %327 = vst [vmem:[#allocation1] ss:$2 sm:$0xff] %v297_v3  ;;  %v422_v32 = vstv %s295_s8  ;;  %s513_s27 = sshll.u32 %s283_s20, 4  ;;  %s515_s28 = sshll.u32 %s511_s19, 4  ;;  %s514_s27 = int_to_ptr.vmem [resolvable:$true] %s513_s27  ;;  %s516_s28 = int_to_ptr.hbm [resolvable:$true] %s515_s28 }
  0x20   : > { %s498_s24 = scalar_lea.sflag [#allocation3], %s281_s14  ;;  %s735_s30 = sshra.s32 %s516_s28, 4  ;;  %s736_s30 = int_to_ptr.hbm [resolvable:$true] %s735_s30 }
  0x21   : > { %v431_v38 = vstv %s614_s11  ;;  %s737_s8 = scalar_lea.hbm %s736_s30, 8  ;;  %s741_s13 = scalar_lea.hbm %s991_s6, 16 }
  0x22   : > { %308 = vperm.xlu1 %704, %v302_v4   ;;  %318 = vperm.xlu0 %703, %v304_v5   ;;  %p738_p1 = scmp.ne.s32.totalorder %s736_s30, %s737_s8  ;;  %p742_p5 = scmp.lt.s32.totalorder %s736_s30, %s991_s6 }
  0x23   : > { %p743_p6 = scmp.lt.s32.totalorder %s741_s13, %s737_s8 }
  0x24   : > { %p739_p2 = pnand %p738_p1, %p882_p4 }
  0x25   : > { %p744_p7 = por %p743_p6, %p742_p5 }
  0x26   : > { %v328_v7 = vld.sshfl [vmem:[#allocation1] sm:$0xff pattern:$0x75316420]  ;;  %v329_v8 = vld.sshfl [vmem:[#allocation1 + $0x8] sm:$0xff pattern:$0x75316420]  ;;  %p740_p3 = pneg %p739_p2 }
  0x27   : > { %615 = vmatpush.msk.msra.mxu0 %vm343_vm0, %v328_v7  ;;  %620 = vmatpush.msk.msra.mxu1 %vm343_vm0, %v329_v8 }
  0x28   : > { %616 = vmatmul.msk.f32.vlgmr.msra.gmra.mxu0 %vm330_vm1, %v298_v6  ;;  %621 = vmatmul.msk.f32.vlgmr.msra.gmra.mxu1 %vm330_vm1, %v298_v6  ;;  %p745_p9 = pnand %p744_p7, %p740_p3 }
  0x29   : > { %634 = vmatpush.msk.msra.mxu2 %vm343_vm0, %v328_v7  ;;  %635 = vmatpush.msk.msra.mxu3 %vm343_vm0, %v329_v8 }
  0x2a   : > { %619 = vmatmul.msk.f32.vlgmr.msra.gmra.mxu2 %vm330_vm1, %v301_v9  ;;  %624 = vmatmul.msk.f32.vlgmr.msra.gmra.mxu3 %vm330_vm1, %v301_v9 }
  0x30   : > { %617 = vmatmul.msk.f32.gmra.mxu0 %vm330_vm1, %v299_v10  ;;  %622 = vmatmul.msk.f32.gmra.mxu1 %vm330_vm1, %v299_v10 }
  0x38   : > { %618 = vmatmul.msk.f32.gmra.mxu0 %vm330_vm1, %v300_v11  ;;  %623 = vmatmul.msk.f32.gmra.mxu1 %vm330_vm1, %v300_v11 }
  0x76   : > { %v445_v4 = vpop.permute.xlu2 %444 }
  0x8c   : > { %v314_v14 = vpop.permute.xlu1 %313  ;;  %v324_v16 = vpop.permute.xlu0 %323 }
  0x94   : > { %v309_v23 = vpop.permute.xlu1 %308  ;;  %v319_v35 = vpop.permute.xlu0 %318 }
  0xa5   : > { %v365_v12 = vpop.f32.mrf.mxu0  ;;  %v394_v13 = vpop.f32.mrf.mxu1 }
  0xa6   : > { %v366_v28 = vadd.f32 %v365_v12, %v309_v23  ;;  %v395_v30 = vadd.f32 %v394_v13, %v309_v23 }
  0xa8   : > { %v406_v40 = vmax.f32 %v366_v28, 0.0  ;;  %v407_v44 = vmax.f32 %v395_v30, 0.0 }
  0xaa   : > { %v414_v51 = vmul.f32 %v406_v40, %v406_v40  ;;  %v415_v53 = vmul.f32 %v407_v44, %v407_v44 }
  0xac   : > { %v423_v60 = vmul.f32 %v422_v32, %v414_v51  ;;  %v424_v62 = vmul.f32 %v422_v32, %v415_v53 }
  0xad   : > { %v368_v17 = vpop.f32.mrf.mxu0  ;;  %v374_v18 = vpop.f32.mrf.mxu2 }
  0xae   : > { %v375_v19 = vadd.f32 %v374_v18, %v324_v16  ;;  %v397_v20 = vpop.f32.mrf.mxu1  ;;  %v403_v21 = vpop.f32.mrf.mxu3  ;;  %v369_v24 = vadd.f32 %v368_v17, %v314_v14  ;;  %v432_v1 = vadd.f32 %v431_v38, %v423_v60  ;;  %v433_v3 = vadd.f32 %v431_v38, %v424_v62 }
  0xaf   : > { %v404_v22 = vadd.f32 %v403_v21, %v324_v16  ;;  %v398_v26 = vadd.f32 %v397_v20, %v314_v14 }
  0xb0   : > { %v412_v25 = vmax.f32 %v375_v19, 0.0  ;;  %v408_v33 = vmax.f32 %v369_v24, 0.0 }
  0xb1   : > { %v413_v27 = vmax.f32 %v404_v22, 0.0  ;;  %v409_v36 = vmax.f32 %v398_v26, 0.0 }
  0xb2   : > { %v420_v29 = vmul.f32 %v412_v25, %v412_v25  ;;  %v416_v47 = vmul.f32 %v408_v33, %v408_v33 }
  0xb3   : > { %v421_v31 = vmul.f32 %v413_v27, %v413_v27  ;;  %v417_v49 = vmul.f32 %v409_v36, %v409_v36 }
  0xb4   : > { %v429_v34 = vmul.f32 %v422_v32, %v420_v29  ;;  %v425_v56 = vmul.f32 %v422_v32, %v416_v47 }
  0xb5   : > { %v371_v37 = vpop.f32.mrf.mxu0  ;;  %v430_v39 = vmul.f32 %v422_v32, %v421_v31  ;;  %v426_v58 = vmul.f32 %v422_v32, %v417_v49 }
  0xb6   : > { %v372_v41 = vadd.f32 %v371_v37, %v319_v35  ;;  %v400_v42 = vpop.f32.mrf.mxu1  ;;  %v438_v43 = vadd.f32 %v431_v38, %v429_v34  ;;  %v434_v63 = vadd.f32 %v431_v38, %v425_v56 }
  0xb7   : > { %v401_v45 = vadd.f32 %v400_v42, %v319_v35  ;;  %v439_v46 = vadd.f32 %v431_v38, %v430_v39  ;;  %v435_v0 = vadd.f32 %v431_v38, %v426_v58 }
  0xb8   : > { %v410_v48 = vmax.f32 %v372_v41, 0.0  ;;  %463 = vmatpush.msrb.mxu2 %v438_v43 }
  0xb9   : > { %v411_v50 = vmax.f32 %v401_v45, 0.0  ;;  %483 = vmatpush.msrb.mxu3 %v439_v46 }
  0xba   : > { %v418_v52 = vmul.f32 %v410_v48, %v410_v48 }
  0xbb   : > { %v419_v54 = vmul.f32 %v411_v50, %v411_v50 }
  0xbc   : > { %v427_v55 = vmul.f32 %v422_v32, %v418_v52 }
  0xbd   : > { %v428_v57 = vmul.f32 %v422_v32, %v419_v54 }
  0xbe   : > { %v436_v59 = vadd.f32 %v431_v38, %v427_v55 }
  0xbf   : > { %v437_v61 = vadd.f32 %v431_v38, %v428_v57 }
  0xc0   : > { %464 = vmatpush.msrb.mxu2 %v436_v59 }
  0xc1   : > { %484 = vmatpush.msrb.mxu3 %v437_v61 }
  0xc2   : > { %465 = vmatpush.msrb.mxu2 %v434_v63 }
  0xc3   : > { %485 = vmatpush.msrb.mxu3 %v435_v0 }
  0xc4   : > { %466 = vmatpush.msrb.mxu2 %v432_v1 }
  0xc5   : > { %486 = vmatpush.msrb.mxu3 %v433_v3  ;;  %625 = vmatmul.msk.f32.vlgmr.msrb.gmra.mxu2 %vm447_vm2, %v440_v2 }
  0xc6   : > { %626 = vmatmul.msk.f32.vlgmr.msrb.gmra.mxu3 %vm447_vm2, %v440_v2 }
 0x148   : > { %v468_v6 = vpop.f32.mrf.mxu2 }
 0x149   : > { %v488_v5 = vpop.f32.mrf.mxu3  ;;  %v469_v9 = vadd.f32 %v468_v6, %v445_v4 }
 0x14a   : > { %v489_v7 = vadd.f32 %v488_v5, %v445_v4 }
 0x14c   : > { %v493_v8 = vrot.slane %v489_v7, 4 }
 0x14e   : > { %v494_v10 = vsel %vm343_vm0, %v469_v9, %v493_v8 }
 0x14f   : > { %496 = vst [vmem:[%s283_s20] sm:$0xff] %v494_v10 }
 0x150   : > { %748 = shalt.err (!%p745_p9)
}
 0x151   : > { %640 = dma.vmem_to_hbm [thread:$0]  (%p882_p4), %s514_s27, 128, %s516_s28, %s498_s24  }
 0x152 PF: > { %p652_p10 = scmp.ge.s32.totalorder %s803_s26, 2  ;;  %s527_s14 = sand.u32 1, %s783_s21  }
 0x153   : > { %s528_s17 = scalar_lea.sflag [#allocation3], %s527_s14 }
 0x154   : > { %p647_p11 = pnand %p652_p10, %p889_p8 }
 0x156   : > { %p648_p12 = pneg %p647_p11 }
 0x158   : > { %778 = dma.done.wait (%p648_p12), %s528_s17, 128  }
 0x159   : > { %780 = vsyncadd (%p648_p12), %s528_s17, 4294967168  ;;  %s20_s26 = sadd.s32 1, %s803_s26   ;;  %s994_s21 = smov %s787_s22 }
 0x15a   : > { %p17_p13 = scmp.ge.s32.totalorder %s20_s26, 4   ;;  %s995_s22 = smov %s791_s23 }
 0x15b   : > { %s996_s23 = smov %s895_s10  ;;  %s997_s24 = smov %s799_s25 }
 0x15c   : > { %s998_s25 = smov %s1000_s29  ;;  %19 = sbr.rel (!%p17_p13) target bundleno = 5 (0x5), region = 84 }
 0x161   :  { %534 = vsyncpa [#allocation3], 1 }
 0x162   :  { %536 = vsyncpa [#allocation3 + $0x1], 1 }
 0x163   :  { %537 = vsyncpa [#allocation4], 1 }
 0x164   :  { %539 = vsyncpa [#allocation4 + $0x1], 1 }

</bundles_post_ra>
